<compile_context>
chip_gen: v7x
topology: tpu7x:2x2x1
jax: 0.10.0
libtpu: 0.0.40
codegen_flags: <defaults>
</compile_context>

<pallas_src>
import functools

import jax
import jax.numpy as jnp
import numpy as np
from jax.experimental import pallas as pl
from jax.experimental.pallas import tpu as pltpu


def _leaky_relu(x, slope=0.2):
    return jnp.where(x > 0, x, slope * x)


def resnet_block_kernel(
    x_ref, w1_ref, b1_ref, w2_ref, b2_ref, ws_ref, bs_ref,   # inputs
    o_ref,                                                   # output
    pad_ref,                                                 # VMEM scratch
    *, dilation: int, length: int, channels: int, batch_tile: int,
):
    """Processes `batch_tile` batch elements per grid step in (C, L) layout.

    x_ref  : (Bt, C, L)  f32          w1_ref / w2_ref : (3, C_out, C_in)  bf16
    b*_ref : (C, 1) f32               ws_ref : (C_out, C_in) bf16
    pad_ref: (C, L + 2) scratch (compute dtype) for the zero-padded conv2 input.
    """
    L, C, d, Bt = length, channels, dilation, batch_tile
    L1 = L - 2 * d                 # length after the un-padded dilated conv
    halo = d + 1                   # conv2 zero padding on each side
    cdt = w1_ref.dtype             # matmul compute dtype (bf16 by default)

    # Hoist the (small) weights / biases once per grid step.
    w1_0, w1_1, w1_2 = w1_ref[0], w1_ref[1], w1_ref[2]
    w2_0, w2_1, w2_2 = w2_ref[0], w2_ref[1], w2_ref[2]
    wsm = ws_ref[...]
    b1v, b2v, bsv = b1_ref[...], b2_ref[...], bs_ref[...]

    # Zero only the two halo column bands (the interior is fully rewritten for
    # every batch element below).  Done every step -> megacore-safe.
    zhalo = jnp.zeros((C, halo), cdt)
    pad_ref[:, pl.ds(0, halo)] = zhalo
    pad_ref[:, pl.ds(halo + L1, halo)] = zhalo

    for b in range(Bt):
        x = x_ref[b]                                        # (C, L) f32

        # ---- shortcut: Conv1d(k=1) -------------------------------------
        ys = jnp.dot(wsm, x.astype(cdt),
                     preferred_element_type=jnp.float32) + bsv

        # ---- LeakyReLU -> Conv1d(k=3, dilation=d, no padding) ----------
        # Taps accumulate into the f32 result of the first dot (no zero-init).
        # Explicit K=3C stacking would add a 3*C*L operand copy for the same
        # total systolic work in this weight-stationary layout, so the three
        # K=C pushes are kept.
        h = _leaky_relu(x).astype(cdt)                      # (C, L)
        y1 = jnp.dot(w1_0, h[:, 0:L1], preferred_element_type=jnp.float32)
        y1 = y1 + jnp.dot(w1_1, h[:, d:d + L1],
                          preferred_element_type=jnp.float32)
        y1 = y1 + jnp.dot(w1_2, h[:, 2 * d:2 * d + L1],
                          preferred_element_type=jnp.float32)
        y1 = y1 + b1v                                       # (C,1) broadcast

        # ---- LeakyReLU -> Conv1d(k=3, dilation=1, padding=d+1) ---------
        pad_ref[:, pl.ds(halo, L1)] = _leaky_relu(y1).astype(cdt)
        y2 = jnp.dot(w2_0, pad_ref[:, pl.ds(0, L)],
                     preferred_element_type=jnp.float32)
        y2 = y2 + jnp.dot(w2_1, pad_ref[:, pl.ds(1, L)],
                          preferred_element_type=jnp.float32)
        y2 = y2 + jnp.dot(w2_2, pad_ref[:, pl.ds(2, L)],
                          preferred_element_type=jnp.float32)
        y2 = y2 + b2v

        o_ref[b] = (ys + y2).astype(o_ref.dtype)


def resnet_block_pallas(x, params, dilation, *, compute_dtype=jnp.bfloat16,
                        batch_tile=None):
    """x: (B, C, L) float32 (PyTorch Conv1d layout, consumed directly)."""
    B, C, L = x.shape
    d = int(dilation)
    L1 = L - 2 * d
    assert L1 > 0, "sequence too short for the dilated (un-padded) conv"

    if batch_tile is None:
        # A few batch elements per grid step (amortize per-step overhead) while
        # keeping the double-buffered x/out blocks modest.
        cap = max(1, (2 * 1024 * 1024) // max(1, C * L * x.dtype.itemsize))
        cap = min(cap, 8, B)
        batch_tile = max(t for t in range(1, cap + 1) if B % t == 0)
    assert B % batch_tile == 0

    # Weight layout: torch (O, I, K) -> kernel (K, O, I), one ready-to-use
    # (C_out, C_in) matmul LHS per tap; cast to the matmul dtype once here.
    w1 = jnp.transpose(params["w1"], (2, 0, 1)).astype(compute_dtype)
    w2 = jnp.transpose(params["w2"], (2, 0, 1)).astype(compute_dtype)
    ws = params["ws"][:, :, 0].astype(compute_dtype)            # (O, I)
    b1 = params["b1"].astype(jnp.float32)[:, None]              # (C, 1)
    b2 = params["b2"].astype(jnp.float32)[:, None]
    bs = params["bs"].astype(jnp.float32)[:, None]

    kernel = functools.partial(
        resnet_block_kernel, dilation=d, length=L, channels=C,
        batch_tile=batch_tile)

    # Advisory cost estimate so XLA schedules around the custom call.
    cbytes = jnp.dtype(compute_dtype).itemsize
    flops = 2 * B * C * C * (3 * L1 + 3 * L + L)
    bytes_accessed = (2 * B * C * L * x.dtype.itemsize
                      + (w1.size + w2.size + ws.size) * cbytes
                      + (b1.size + b2.size + bs.size) * 4)
    cost = pl.CostEstimate(flops=int(flops), transcendentals=0,
                           bytes_accessed=int(bytes_accessed))

    # Rough VMEM need: double-buffered x/out blocks + weights + pad scratch.
    vmem_est = (4 * batch_tile * C * L * x.dtype.itemsize
                + 2 * (w1.size + w2.size + ws.size) * cbytes
                + C * (L + 2) * cbytes + 3 * C * 4)
    cp = dict(dimension_semantics=("parallel",))   # batch steps are independent
    if vmem_est > 16 * 2**20:
        cp["vmem_limit_bytes"] = int(min(vmem_est * 3 // 2, 64 * 2**20))

    out = pl.pallas_call(
        kernel,
        out_shape=jax.ShapeDtypeStruct((B, C, L), x.dtype),
        grid=(B // batch_tile,),
        in_specs=[
            pl.BlockSpec((batch_tile, C, L), lambda i: (i, 0, 0)),   # x
            pl.BlockSpec((3, C, C), lambda i: (0, 0, 0)),            # w1
            pl.BlockSpec((C, 1), lambda i: (0, 0)),                  # b1
            pl.BlockSpec((3, C, C), lambda i: (0, 0, 0)),            # w2
            pl.BlockSpec((C, 1), lambda i: (0, 0)),                  # b2
            pl.BlockSpec((C, C), lambda i: (0, 0)),                  # ws
            pl.BlockSpec((C, 1), lambda i: (0, 0)),                  # bs
        ],
        out_specs=pl.BlockSpec((batch_tile, C, L), lambda i: (i, 0, 0)),
        scratch_shapes=[pltpu.VMEM((C, L + 2), compute_dtype)],
        compiler_params=pltpu.CompilerParams(**cp),
        cost_estimate=cost,
    )(x, w1, b1, w2, b2, ws, bs)
    return out


# ---------------- deterministic parameter construction -----------------------

def _weight_norm_weight(key, out_c, in_c, k):
    """Effective weight of torch.nn.utils.weight_norm (norm over dims 1,2)."""
    kv, kg = jax.random.split(key)
    v = jax.random.normal(kv, (out_c, in_c, k), jnp.float32) * 0.2
    g = jax.random.uniform(kg, (out_c,), jnp.float32, minval=0.5, maxval=1.5)
    norm = jnp.sqrt(jnp.sum(v * v, axis=(1, 2), keepdims=True))
    return g[:, None, None] * v / norm


def make_params(key, dim):
    keys = jax.random.split(key, 6)
    return {
        "w1": _weight_norm_weight(keys[0], dim, dim, 3),
        "b1": jax.random.normal(keys[1], (dim,), jnp.float32) * 0.1,
        "w2": _weight_norm_weight(keys[2], dim, dim, 3),
        "b2": jax.random.normal(keys[3], (dim,), jnp.float32) * 0.1,
        "ws": _weight_norm_weight(keys[4], dim, dim, 1),
        "bs": jax.random.normal(keys[5], (dim,), jnp.float32) * 0.1,
    }


# ---------------- pure-JAX reference (for correctness check) -----------------

def _conv1d_ref(x, w, b, dilation, padding, compute_dtype):
    out = jax.lax.conv_general_dilated(
        x.astype(compute_dtype), w.astype(compute_dtype),
        window_strides=(1,), padding=[(padding, padding)],
        rhs_dilation=(dilation,), dimension_numbers=("NCH", "OIH", "NCH"),
        preferred_element_type=jnp.float32)
    return out + b[None, :, None]


def resnet_block_ref(x, params, dilation, compute_dtype=jnp.float32):
    h = _conv1d_ref(_leaky_relu(x), params["w1"], params["b1"],
                    dilation, 0, compute_dtype)
    h = _conv1d_ref(_leaky_relu(h), params["w2"], params["b2"],
                    1, dilation + 1, compute_dtype)
    s = _conv1d_ref(x, params["ws"], params["bs"], 1, 0, compute_dtype)
    return s + h


if __name__ == "__main__":
    B, DIM, L = 2, 8, 32
    DILATION = 3

    key = jax.random.PRNGKey(0)
    kx, kp = jax.random.split(key)
    x = jax.random.normal(kx, (B, DIM, L), jnp.float32)   # PyTorch (B, C, L)
    params = make_params(kp, DIM)

    out = jax.block_until_ready(resnet_block_pallas(x, params, DILATION))

    # Reference with matched matmul-input precision (bf16 in, f32 accumulate).
    ref = jax.block_until_ready(
        resnet_block_ref(x, params, DILATION, compute_dtype=jnp.bfloat16))
    np.testing.assert_allclose(np.asarray(out), np.asarray(ref),
                               rtol=1e-2, atol=1e-2)

    print("KERNEL_OK")
</pallas_src>

<mosaic_0001>
module attributes {stable_mosaic.version = 11 : i64} {
  func.func @resnet_block_kernel(%arg0: i32, %arg1: memref<2x8x32xf32, #tpu.memory_space<vmem>>, %arg2: memref<3x8x8xbf16, #tpu.memory_space<vmem>>, %arg3: memref<8x1xf32, #tpu.memory_space<vmem>>, %arg4: memref<3x8x8xbf16, #tpu.memory_space<vmem>>, %arg5: memref<8x1xf32, #tpu.memory_space<vmem>>, %arg6: memref<8x8xbf16, #tpu.memory_space<vmem>>, %arg7: memref<8x1xf32, #tpu.memory_space<vmem>>, %arg8: memref<2x8x32xf32, #tpu.memory_space<vmem>>, %arg9: memref<8x34xbf16, #tpu.memory_space<vmem>>) attributes {dimension_semantics = [#tpu.dimension_semantics<parallel>], iteration_bounds = array<i64: 1>, scalar_prefetch = 0 : i64, scratch_operands = 1 : i64, tpu.core_type = #tpu.core_type<tc>, window_params = [{transform_indices = @transform_0, window_bounds = array<i64: 2, 8, 32>}, {pipeline_mode = #tpu.pipeline_mode<synchronous>, transform_indices = @transform_1, window_bounds = array<i64: 3, 8, 8>}, {pipeline_mode = #tpu.pipeline_mode<synchronous>, transform_indices = @transform_2, window_bounds = array<i64: 8, 1>}, {pipeline_mode = #tpu.pipeline_mode<synchronous>, transform_indices = @transform_3, window_bounds = array<i64: 3, 8, 8>}, {pipeline_mode = #tpu.pipeline_mode<synchronous>, transform_indices = @transform_4, window_bounds = array<i64: 8, 1>}, {pipeline_mode = #tpu.pipeline_mode<synchronous>, transform_indices = @transform_5, window_bounds = array<i64: 8, 8>}, {pipeline_mode = #tpu.pipeline_mode<synchronous>, transform_indices = @transform_6, window_bounds = array<i64: 8, 1>}, {transform_indices = @transform_7, window_bounds = array<i64: 2, 8, 32>}]} {
    %c0 = arith.constant 0 : index
    %c0_0 = arith.constant 0 : index
    %c0_1 = arith.constant 0 : index
    %0 = vector.load %arg2[%c0, %c0_0, %c0_1] : memref<3x8x8xbf16, #tpu.memory_space<vmem>>, vector<1x8x8xbf16>
    %1 = vector.shape_cast %0 : vector<1x8x8xbf16> to vector<8x8xbf16>
    %c1 = arith.constant 1 : index
    %c0_2 = arith.constant 0 : index
    %c0_3 = arith.constant 0 : index
    %2 = vector.load %arg2[%c1, %c0_2, %c0_3] : memref<3x8x8xbf16, #tpu.memory_space<vmem>>, vector<1x8x8xbf16>
    %3 = vector.shape_cast %2 : vector<1x8x8xbf16> to vector<8x8xbf16>
    %c2 = arith.constant 2 : index
    %c0_4 = arith.constant 0 : index
    %c0_5 = arith.constant 0 : index
    %4 = vector.load %arg2[%c2, %c0_4, %c0_5] : memref<3x8x8xbf16, #tpu.memory_space<vmem>>, vector<1x8x8xbf16>
    %5 = vector.shape_cast %4 : vector<1x8x8xbf16> to vector<8x8xbf16>
    %c0_6 = arith.constant 0 : index
    %c0_7 = arith.constant 0 : index
    %c0_8 = arith.constant 0 : index
    %6 = vector.load %arg4[%c0_6, %c0_7, %c0_8] : memref<3x8x8xbf16, #tpu.memory_space<vmem>>, vector<1x8x8xbf16>
    %7 = vector.shape_cast %6 : vector<1x8x8xbf16> to vector<8x8xbf16>
    %c1_9 = arith.constant 1 : index
    %c0_10 = arith.constant 0 : index
    %c0_11 = arith.constant 0 : index
    %8 = vector.load %arg4[%c1_9, %c0_10, %c0_11] : memref<3x8x8xbf16, #tpu.memory_space<vmem>>, vector<1x8x8xbf16>
    %9 = vector.shape_cast %8 : vector<1x8x8xbf16> to vector<8x8xbf16>
    %c2_12 = arith.constant 2 : index
    %c0_13 = arith.constant 0 : index
    %c0_14 = arith.constant 0 : index
    %10 = vector.load %arg4[%c2_12, %c0_13, %c0_14] : memref<3x8x8xbf16, #tpu.memory_space<vmem>>, vector<1x8x8xbf16>
    %11 = vector.shape_cast %10 : vector<1x8x8xbf16> to vector<8x8xbf16>
    %c0_15 = arith.constant 0 : index
    %c0_16 = arith.constant 0 : index
    %12 = vector.load %arg6[%c0_15, %c0_16] : memref<8x8xbf16, #tpu.memory_space<vmem>>, vector<8x8xbf16>
    %c0_17 = arith.constant 0 : index
    %c0_18 = arith.constant 0 : index
    %13 = vector.load %arg3[%c0_17, %c0_18] : memref<8x1xf32, #tpu.memory_space<vmem>>, vector<8x1xf32>
    %c0_19 = arith.constant 0 : index
    %c0_20 = arith.constant 0 : index
    %14 = vector.load %arg5[%c0_19, %c0_20] : memref<8x1xf32, #tpu.memory_space<vmem>>, vector<8x1xf32>
    %c0_21 = arith.constant 0 : index
    %c0_22 = arith.constant 0 : index
    %15 = vector.load %arg7[%c0_21, %c0_22] : memref<8x1xf32, #tpu.memory_space<vmem>>, vector<8x1xf32>
    %cst = arith.constant 0.000000e+00 : bf16
    %16 = vector.broadcast %cst : bf16 to vector<8x4xbf16>
    %c0_23 = arith.constant 0 : index
    %c0_24 = arith.constant 0 : index
    %17 = vector.load %arg9[%c0_23, %c0_24] : memref<8x34xbf16, #tpu.memory_space<vmem>>, vector<8x4xbf16>
    tpu.vector_store %arg9[%c0_23, %c0_24], %16 {strides = array<i32>} : memref<8x34xbf16, #tpu.memory_space<vmem>>, vector<8x4xbf16>,
    %c0_25 = arith.constant 0 : index
    %c30 = arith.constant 30 : index
    %18 = vector.load %arg9[%c0_25, %c30] : memref<8x34xbf16, #tpu.memory_space<vmem>>, vector<8x4xbf16>
    tpu.vector_store %arg9[%c0_25, %c30], %16 {strides = array<i32>} : memref<8x34xbf16, #tpu.memory_space<vmem>>, vector<8x4xbf16>,
    %c0_26 = arith.constant 0 : index
    %c0_27 = arith.constant 0 : index
    %c0_28 = arith.constant 0 : index
    %19 = vector.load %arg1[%c0_26, %c0_27, %c0_28] : memref<2x8x32xf32, #tpu.memory_space<vmem>>, vector<1x8x32xf32>
    %20 = vector.shape_cast %19 : vector<1x8x32xf32> to vector<8x32xf32>
    %21 = arith.truncf %20 : vector<8x32xf32> to vector<8x32xbf16>
    %cst_29 = arith.constant dense<0.000000e+00> : vector<8x32xf32>
    %22 = tpu.matmul %12, %21, %cst_29 {dimension_numbers = #tpu.dot_dimension_numbers<[1], [0], [0], [1], [0, 0, 1, 1], [], []>} : vector<8x8xbf16>, vector<8x32xbf16>, vector<8x32xf32> -> vector<8x32xf32>
    %23 = vector.broadcast %15 : vector<8x1xf32> to vector<8x32xf32>
    %24 = arith.addf %22, %23 : vector<8x32xf32>
    %cst_30 = arith.constant 0.000000e+00 : f32
    %25 = vector.broadcast %cst_30 : f32 to vector<8x32xf32>
    %26 = arith.cmpf ogt, %20, %25 : vector<8x32xf32>
    %cst_31 = arith.constant 2.000000e-01 : f32
    %27 = vector.broadcast %cst_31 : f32 to vector<8x32xf32>
    %28 = arith.mulf %27, %20 : vector<8x32xf32>
    %29 = arith.select %26, %20, %28 : vector<8x32xi1>, vector<8x32xf32>
    %30 = arith.truncf %29 : vector<8x32xf32> to vector<8x32xbf16>
    %31 = vector.extract_strided_slice %30 {offsets = [0, 0], sizes = [8, 26], strides = [1, 1]} : vector<8x32xbf16> to vector<8x26xbf16>
    %cst_32 = arith.constant dense<0.000000e+00> : vector<8x26xf32>
    %32 = tpu.matmul %1, %31, %cst_32 {dimension_numbers = #tpu.dot_dimension_numbers<[1], [0], [0], [1], [0, 0, 1, 1], [], []>} : vector<8x8xbf16>, vector<8x26xbf16>, vector<8x26xf32> -> vector<8x26xf32>
    %33 = vector.extract_strided_slice %30 {offsets = [0, 3], sizes = [8, 26], strides = [1, 1]} : vector<8x32xbf16> to vector<8x26xbf16>
    %cst_33 = arith.constant dense<0.000000e+00> : vector<8x26xf32>
    %34 = tpu.matmul %3, %33, %cst_33 {dimension_numbers = #tpu.dot_dimension_numbers<[1], [0], [0], [1], [0, 0, 1, 1], [], []>} : vector<8x8xbf16>, vector<8x26xbf16>, vector<8x26xf32> -> vector<8x26xf32>
    %35 = arith.addf %32, %34 : vector<8x26xf32>
    %36 = vector.extract_strided_slice %30 {offsets = [0, 6], sizes = [8, 26], strides = [1, 1]} : vector<8x32xbf16> to vector<8x26xbf16>
    %cst_34 = arith.constant dense<0.000000e+00> : vector<8x26xf32>
    %37 = tpu.matmul %5, %36, %cst_34 {dimension_numbers = #tpu.dot_dimension_numbers<[1], [0], [0], [1], [0, 0, 1, 1], [], []>} : vector<8x8xbf16>, vector<8x26xbf16>, vector<8x26xf32> -> vector<8x26xf32>
    %38 = arith.addf %35, %37 : vector<8x26xf32>
    %39 = vector.broadcast %13 : vector<8x1xf32> to vector<8x26xf32>
    %40 = arith.addf %38, %39 : vector<8x26xf32>
    %cst_35 = arith.constant 0.000000e+00 : f32
    %41 = vector.broadcast %cst_35 : f32 to vector<8x26xf32>
    %42 = arith.cmpf ogt, %40, %41 : vector<8x26xf32>
    %cst_36 = arith.constant 2.000000e-01 : f32
    %43 = vector.broadcast %cst_36 : f32 to vector<8x26xf32>
    %44 = arith.mulf %43, %40 : vector<8x26xf32>
    %45 = arith.select %42, %40, %44 : vector<8x26xi1>, vector<8x26xf32>
    %46 = arith.truncf %45 : vector<8x26xf32> to vector<8x26xbf16>
    %c0_37 = arith.constant 0 : index
    %c4 = arith.constant 4 : index
    %47 = vector.load %arg9[%c0_37, %c4] : memref<8x34xbf16, #tpu.memory_space<vmem>>, vector<8x26xbf16>
    tpu.vector_store %arg9[%c0_37, %c4], %46 {strides = array<i32>} : memref<8x34xbf16, #tpu.memory_space<vmem>>, vector<8x26xbf16>,
    %c0_38 = arith.constant 0 : index
    %c0_39 = arith.constant 0 : index
    %48 = vector.load %arg9[%c0_38, %c0_39] : memref<8x34xbf16, #tpu.memory_space<vmem>>, vector<8x32xbf16>
    %cst_40 = arith.constant dense<0.000000e+00> : vector<8x32xf32>
    %49 = tpu.matmul %7, %48, %cst_40 {dimension_numbers = #tpu.dot_dimension_numbers<[1], [0], [0], [1], [0, 0, 1, 1], [], []>} : vector<8x8xbf16>, vector<8x32xbf16>, vector<8x32xf32> -> vector<8x32xf32>
    %c0_41 = arith.constant 0 : index
    %c1_42 = arith.constant 1 : index
    %50 = vector.load %arg9[%c0_41, %c1_42] : memref<8x34xbf16, #tpu.memory_space<vmem>>, vector<8x32xbf16>
    %cst_43 = arith.constant dense<0.000000e+00> : vector<8x32xf32>
    %51 = tpu.matmul %9, %50, %cst_43 {dimension_numbers = #tpu.dot_dimension_numbers<[1], [0], [0], [1], [0, 0, 1, 1], [], []>} : vector<8x8xbf16>, vector<8x32xbf16>, vector<8x32xf32> -> vector<8x32xf32>
    %52 = arith.addf %49, %51 : vector<8x32xf32>
    %c0_44 = arith.constant 0 : index
    %c2_45 = arith.constant 2 : index
    %53 = vector.load %arg9[%c0_44, %c2_45] : memref<8x34xbf16, #tpu.memory_space<vmem>>, vector<8x32xbf16>
    %cst_46 = arith.constant dense<0.000000e+00> : vector<8x32xf32>
    %54 = tpu.matmul %11, %53, %cst_46 {dimension_numbers = #tpu.dot_dimension_numbers<[1], [0], [0], [1], [0, 0, 1, 1], [], []>} : vector<8x8xbf16>, vector<8x32xbf16>, vector<8x32xf32> -> vector<8x32xf32>
    %55 = arith.addf %52, %54 : vector<8x32xf32>
    %56 = vector.broadcast %14 : vector<8x1xf32> to vector<8x32xf32>
    %57 = arith.addf %55, %56 : vector<8x32xf32>
    %58 = arith.addf %24, %57 : vector<8x32xf32>
    %c0_47 = arith.constant 0 : index
    %c0_48 = arith.constant 0 : index
    %c0_49 = arith.constant 0 : index
    %59 = vector.load %arg8[%c0_47, %c0_48, %c0_49] : memref<2x8x32xf32, #tpu.memory_space<vmem>>, vector<1x8x32xf32>
    %60 = vector.shape_cast %59 : vector<1x8x32xf32> to vector<8x32xf32>
    %61 = vector.shape_cast %58 : vector<8x32xf32> to vector<1x8x32xf32>
    tpu.vector_store %arg8[%c0_47, %c0_48, %c0_49], %61 {strides = array<i32>} : memref<2x8x32xf32, #tpu.memory_space<vmem>>, vector<1x8x32xf32>,
    %c1_50 = arith.constant 1 : index
    %c0_51 = arith.constant 0 : index
    %c0_52 = arith.constant 0 : index
    %62 = vector.load %arg1[%c1_50, %c0_51, %c0_52] : memref<2x8x32xf32, #tpu.memory_space<vmem>>, vector<1x8x32xf32>
    %63 = vector.shape_cast %62 : vector<1x8x32xf32> to vector<8x32xf32>
    %64 = arith.truncf %63 : vector<8x32xf32> to vector<8x32xbf16>
    %cst_53 = arith.constant dense<0.000000e+00> : vector<8x32xf32>
    %65 = tpu.matmul %12, %64, %cst_53 {dimension_numbers = #tpu.dot_dimension_numbers<[1], [0], [0], [1], [0, 0, 1, 1], [], []>} : vector<8x8xbf16>, vector<8x32xbf16>, vector<8x32xf32> -> vector<8x32xf32>
    %66 = vector.broadcast %15 : vector<8x1xf32> to vector<8x32xf32>
    %67 = arith.addf %65, %66 : vector<8x32xf32>
    %cst_54 = arith.constant 0.000000e+00 : f32
    %68 = vector.broadcast %cst_54 : f32 to vector<8x32xf32>
    %69 = arith.cmpf ogt, %63, %68 : vector<8x32xf32>
    %cst_55 = arith.constant 2.000000e-01 : f32
    %70 = vector.broadcast %cst_55 : f32 to vector<8x32xf32>
    %71 = arith.mulf %70, %63 : vector<8x32xf32>
    %72 = arith.select %69, %63, %71 : vector<8x32xi1>, vector<8x32xf32>
    %73 = arith.truncf %72 : vector<8x32xf32> to vector<8x32xbf16>
    %74 = vector.extract_strided_slice %73 {offsets = [0, 0], sizes = [8, 26], strides = [1, 1]} : vector<8x32xbf16> to vector<8x26xbf16>
    %cst_56 = arith.constant dense<0.000000e+00> : vector<8x26xf32>
    %75 = tpu.matmul %1, %74, %cst_56 {dimension_numbers = #tpu.dot_dimension_numbers<[1], [0], [0], [1], [0, 0, 1, 1], [], []>} : vector<8x8xbf16>, vector<8x26xbf16>, vector<8x26xf32> -> vector<8x26xf32>
    %76 = vector.extract_strided_slice %73 {offsets = [0, 3], sizes = [8, 26], strides = [1, 1]} : vector<8x32xbf16> to vector<8x26xbf16>
    %cst_57 = arith.constant dense<0.000000e+00> : vector<8x26xf32>
    %77 = tpu.matmul %3, %76, %cst_57 {dimension_numbers = #tpu.dot_dimension_numbers<[1], [0], [0], [1], [0, 0, 1, 1], [], []>} : vector<8x8xbf16>, vector<8x26xbf16>, vector<8x26xf32> -> vector<8x26xf32>
    %78 = arith.addf %75, %77 : vector<8x26xf32>
    %79 = vector.extract_strided_slice %73 {offsets = [0, 6], sizes = [8, 26], strides = [1, 1]} : vector<8x32xbf16> to vector<8x26xbf16>
    %cst_58 = arith.constant dense<0.000000e+00> : vector<8x26xf32>
    %80 = tpu.matmul %5, %79, %cst_58 {dimension_numbers = #tpu.dot_dimension_numbers<[1], [0], [0], [1], [0, 0, 1, 1], [], []>} : vector<8x8xbf16>, vector<8x26xbf16>, vector<8x26xf32> -> vector<8x26xf32>
    %81 = arith.addf %78, %80 : vector<8x26xf32>
    %82 = vector.broadcast %13 : vector<8x1xf32> to vector<8x26xf32>
    %83 = arith.addf %81, %82 : vector<8x26xf32>
    %cst_59 = arith.constant 0.000000e+00 : f32
    %84 = vector.broadcast %cst_59 : f32 to vector<8x26xf32>
    %85 = arith.cmpf ogt, %83, %84 : vector<8x26xf32>
    %cst_60 = arith.constant 2.000000e-01 : f32
    %86 = vector.broadcast %cst_60 : f32 to vector<8x26xf32>
    %87 = arith.mulf %86, %83 : vector<8x26xf32>
    %88 = arith.select %85, %83, %87 : vector<8x26xi1>, vector<8x26xf32>
    %89 = arith.truncf %88 : vector<8x26xf32> to vector<8x26xbf16>
    %c0_61 = arith.constant 0 : index
    %c4_62 = arith.constant 4 : index
    %90 = vector.load %arg9[%c0_61, %c4_62] : memref<8x34xbf16, #tpu.memory_space<vmem>>, vector<8x26xbf16>
    tpu.vector_store %arg9[%c0_61, %c4_62], %89 {strides = array<i32>} : memref<8x34xbf16, #tpu.memory_space<vmem>>, vector<8x26xbf16>,
    %c0_63 = arith.constant 0 : index
    %c0_64 = arith.constant 0 : index
    %91 = vector.load %arg9[%c0_63, %c0_64] : memref<8x34xbf16, #tpu.memory_space<vmem>>, vector<8x32xbf16>
    %cst_65 = arith.constant dense<0.000000e+00> : vector<8x32xf32>
    %92 = tpu.matmul %7, %91, %cst_65 {dimension_numbers = #tpu.dot_dimension_numbers<[1], [0], [0], [1], [0, 0, 1, 1], [], []>} : vector<8x8xbf16>, vector<8x32xbf16>, vector<8x32xf32> -> vector<8x32xf32>
    %c0_66 = arith.constant 0 : index
    %c1_67 = arith.constant 1 : index
    %93 = vector.load %arg9[%c0_66, %c1_67] : memref<8x34xbf16, #tpu.memory_space<vmem>>, vector<8x32xbf16>
    %cst_68 = arith.constant dense<0.000000e+00> : vector<8x32xf32>
    %94 = tpu.matmul %9, %93, %cst_68 {dimension_numbers = #tpu.dot_dimension_numbers<[1], [0], [0], [1], [0, 0, 1, 1], [], []>} : vector<8x8xbf16>, vector<8x32xbf16>, vector<8x32xf32> -> vector<8x32xf32>
    %95 = arith.addf %92, %94 : vector<8x32xf32>
    %c0_69 = arith.constant 0 : index
    %c2_70 = arith.constant 2 : index
    %96 = vector.load %arg9[%c0_69, %c2_70] : memref<8x34xbf16, #tpu.memory_space<vmem>>, vector<8x32xbf16>
    %cst_71 = arith.constant dense<0.000000e+00> : vector<8x32xf32>
    %97 = tpu.matmul %11, %96, %cst_71 {dimension_numbers = #tpu.dot_dimension_numbers<[1], [0], [0], [1], [0, 0, 1, 1], [], []>} : vector<8x8xbf16>, vector<8x32xbf16>, vector<8x32xf32> -> vector<8x32xf32>
    %98 = arith.addf %95, %97 : vector<8x32xf32>
    %99 = vector.broadcast %14 : vector<8x1xf32> to vector<8x32xf32>
    %100 = arith.addf %98, %99 : vector<8x32xf32>
    %101 = arith.addf %67, %100 : vector<8x32xf32>
    %c1_72 = arith.constant 1 : index
    %c0_73 = arith.constant 0 : index
    %c0_74 = arith.constant 0 : index
    %102 = vector.load %arg8[%c1_72, %c0_73, %c0_74] : memref<2x8x32xf32, #tpu.memory_space<vmem>>, vector<1x8x32xf32>
    %103 = vector.shape_cast %102 : vector<1x8x32xf32> to vector<8x32xf32>
    %104 = vector.shape_cast %101 : vector<8x32xf32> to vector<1x8x32xf32>
    tpu.vector_store %arg8[%c1_72, %c0_73, %c0_74], %104 {strides = array<i32>} : memref<2x8x32xf32, #tpu.memory_space<vmem>>, vector<1x8x32xf32>,
    return
  }
  func.func @transform_0(%arg0: i32) -> (i32, i32, i32) {
    %c0_i32 = arith.constant 0 : i32
    %c0_i32_0 = arith.constant 0 : i32
    %c0_i32_1 = arith.constant 0 : i32
    return %arg0, %c0_i32, %c0_i32_0 : i32, i32, i32
  }
  func.func @transform_1(%arg0: i32) -> (i32, i32, i32) {
    %c0_i32 = arith.constant 0 : i32
    %c0_i32_0 = arith.constant 0 : i32
    %c0_i32_1 = arith.constant 0 : i32
    %c0_i32_2 = arith.constant 0 : i32
    return %c0_i32, %c0_i32_0, %c0_i32_1 : i32, i32, i32
  }
  func.func @transform_2(%arg0: i32) -> (i32, i32) {
    %c0_i32 = arith.constant 0 : i32
    %c0_i32_0 = arith.constant 0 : i32
    %c0_i32_1 = arith.constant 0 : i32
    return %c0_i32, %c0_i32_0 : i32, i32
  }
  func.func @transform_3(%arg0: i32) -> (i32, i32, i32) {
    %c0_i32 = arith.constant 0 : i32
    %c0_i32_0 = arith.constant 0 : i32
    %c0_i32_1 = arith.constant 0 : i32
    %c0_i32_2 = arith.constant 0 : i32
    return %c0_i32, %c0_i32_0, %c0_i32_1 : i32, i32, i32
  }
  func.func @transform_4(%arg0: i32) -> (i32, i32) {
    %c0_i32 = arith.constant 0 : i32
    %c0_i32_0 = arith.constant 0 : i32
    %c0_i32_1 = arith.constant 0 : i32
    return %c0_i32, %c0_i32_0 : i32, i32
  }
  func.func @transform_5(%arg0: i32) -> (i32, i32) {
    %c0_i32 = arith.constant 0 : i32
    %c0_i32_0 = arith.constant 0 : i32
    %c0_i32_1 = arith.constant 0 : i32
    return %c0_i32, %c0_i32_0 : i32, i32
  }
  func.func @transform_6(%arg0: i32) -> (i32, i32) {
    %c0_i32 = arith.constant 0 : i32
    %c0_i32_0 = arith.constant 0 : i32
    %c0_i32_1 = arith.constant 0 : i32
    return %c0_i32, %c0_i32_0 : i32, i32
  }
  func.func @transform_7(%arg0: i32) -> (i32, i32, i32) {
    %c0_i32 = arith.constant 0 : i32
    %c0_i32_0 = arith.constant 0 : i32
    %c0_i32_1 = arith.constant 0 : i32
    return %arg0, %c0_i32, %c0_i32_0 : i32, i32, i32
  }
}

</mosaic_0001>

<bundles_post_ra>
// kernel: tpu_custom_call.1
= control target key start
LH: loop header
LB: loop body
LE: loop exit
PB: predicated region body
PF: predicated region fallthrough
CT: control target
= control target key end

     0   :  { %12 = vsyncpa [#allocation4], 0  ;;  %s1224_s0 = inlined_call_operand.vmem [shape: f32[2,8,32], index: 0, kind: input, shape index: {}]   ;;  %s1225_s1 = inlined_call_operand.vmem [shape: bf16[3,8,8], index: 1, kind: input, shape index: {}]   ;;  %s1226_s2 = inlined_call_operand.vmem [shape: f32[8,1], index: 2, kind: input, shape index: {}]   ;;  %s1227_s3 = inlined_call_operand.hbm [shape: bf16[3,8,8], index: 3, kind: input, shape index: {}]   ;;  %s1228_s4 = inlined_call_operand.vmem [shape: f32[8,1], index: 4, kind: input, shape index: {}]   ;;  %s1229_s5 = inlined_call_operand.vmem [shape: bf16[8,8], index: 5, kind: input, shape index: {}]   ;;  %s1230_s6 = inlined_call_operand.vmem [shape: f32[8,1], index: 6, kind: input, shape index: {}]   ;;  %s1231_s7 = inlined_call_operand.hbm [shape: f32[2,8,32], index: 7, kind: output, shape index: {}]  }
   0x1   :  { %13 = vsyncpa [#allocation5], 0  ;;  %s1021_s24 = smov [#allocation3]   ;;  %s973_s28 = scalar_lea.hbm %s1227_s3, 192 }
   0x2   :  { %s25_s25 = sshll.u32 %s1021_s24, 4  ;;  %p974_p0 = scmp.ne.s32.totalorder %s1227_s3, %s973_s28  ;;  %s26_s25 = int_to_ptr.vmem [resolvable:$true] %s25_s25 }
   0x3   :  { %p977_p1 = scmp.lt.u32.totalorder %s973_s28, %s1227_s3 }
   0x5   :  { %p979_p2 = pnand %p977_p1, %p974_p0 }
   0x7   :  { %982 = shalt.err (!%p979_p2)
}
   0x8   :  { %s983_s10 = scalar_lea.vmem %s26_s25, 192  ;;  %p988_p4 = scmp.lt.s32.totalorder %s26_s25, %s26_s25 }
   0x9   :  { %p984_p3 = scmp.ne.s32.totalorder %s26_s25, %s983_s10  ;;  %p989_p5 = scmp.lt.s32.totalorder %s983_s10, %s983_s10 }
   0xb   :  { %p990_p6 = por %p989_p5, %p988_p4 }
   0xd   :  { %p991_p7 = pnand %p990_p6, %p984_p3 }
   0xf   :  { %994 = shalt.err (!%p991_p7)
}
  0x10   :  { %s1022_s11 = smov 64   ;;  %s1023_s12 = smov 4  }
  0x11   :  { %31 = dma.hbm_to_vmem [thread:$0]  %s1227_s3, 192, %s26_s25, [#allocation4], %s1022_s11, %s1022_s11, %s1023_s12  }
  0x12   :  { %1017 = dma.done.wait [#allocation4], 192  }
  0x13   :  { %1018 = vsyncadd [#allocation4], 4294967104  ;;  %v1024_v0 = vmov 0.0   ;;  %vm1025_vm0 = vmmov 0   ;;  %v60_v1 = vld [vmem:[%s1224_s0] sm:$0xff]  ;;  %vm71_vm1 = vcmask 1043456  }
  0x14   :  { %844 = vmatprep.subr.bf16.mxu0 %v1024_v0  ;;  %862 = vmatprep.subr.bf16.mxu1 %v1024_v0  ;;  %vm115_vm2 = vcmp.gt.f32.partialorder %v60_v1, 0.0  ;;  %v116_v2 = vmul.f32 0.2, %v60_v1  ;;  %v61_v3 = vpack.c.bf16 %v60_v1, %v60_v1  ;;  %v1100_v7 = vld [vmem:[%s1229_s5] sm:$0xf]  ;;  %vm67_vm3 = vcmask 64512  }
  0x15   :  { %846 = vmatprep.mubr.msk.bf16.mxu0 %vm1025_vm0, %v1024_v0  ;;  %864 = vmatprep.mubr.msk.bf16.mxu1 %vm1025_vm0, %v1024_v0  ;;  %vm56_vm4 = vcmask 27648   ;;  %v53_v8 = vld [vmem:[%s1226_s2] sm:$0xff]  ;;  %s1026_s20 = smov 125   ;;  %v1027_v9 = vmov 0   ;;  %s1028_s5 = smov 122   ;;  %vm58_vm5 = vcmask 273648  }
  0x16   :  { %v117_v4 = vsel %vm115_vm2, %v60_v1, %v116_v2  ;;  %v73_v5 = vsel %vm71_vm1, %v61_v3, 0  ;;  %969 = vset.pattern.permute.xlu1 %v1027_v9  ;;  %57 = vst.msk [vmem:[#allocation2] sm:$0xf] %vm56_vm4, %v1027_v9  ;;  %970 = vset.pattern.permute.xlu0 %v1027_v9  ;;  %v1116_v12 = vld [vmem:[%s1225_s1 + $0x4] sm:$0xf]  ;;  %v804_v37 = vld [vmem:[%s1224_s0 + $0x8] sm:$0xff] }
  0x17   :  { %v118_v6 = vpack.c.bf16 %v117_v4, %v117_v4  ;;  %845 = vmatpush3.bf16.msra.mxu0 %v73_v5  ;;  %265 = vperm.xlu1 %969, %v53_v8   ;;  %v1126_v16 = vld [vmem:[%s1225_s1 + $0x8] sm:$0xf]  ;;  %v42_v17 = vld [vmem:[%s1225_s1] sm:$0xf]  ;;  %59 = vst.msk [vmem:[#allocation2] sm:$0xf] %vm58_vm5, %v1027_v9  ;;  %v439_v42 = vpack.c.bf16 %v804_v37, %v804_v37 }
  0x18   :  { %850 = vmatprep.subr.bf16.mxu0 %v1024_v0  ;;  %vm483_vm7 = vcmp.gt.f32.partialorder %v804_v37, 0.0  ;;  %v484_v38 = vmul.f32 0.2, %v804_v37  ;;  %vm279_vm8 = vcmask 240672   ;;  %s1029_s0 = smov 127   ;;  %s1030_s27 = smov 126  }
  0x19   :  { %120 = vrot.lane.b32.xlu0 %v118_v6, %s1026_s20  ;;  %v172_v13 = vsel %vm71_vm1, %v118_v6, 0  ;;  %v441_v43 = vsel %vm71_vm1, %v439_v42, 0  ;;  %v49_v51 = vld [vmem:[#allocation3 + $0x4] sm:$0xf]  ;;  %v47_v54 = vld [vmem:[#allocation3] sm:$0xf] }
  0x1a   :  { %847 = vmatmul.mubr.msk.bf16.vlgmr.msra.gmra.mrb[0].mxu0 %vm67_vm3, %v1100_v7  ;;  %v485_v39 = vsel %vm483_vm7, %v804_v37, %v484_v38  ;;  %v51_v57 = vld [vmem:[#allocation3 + $0x8] sm:$0xf]  ;;  %vm435_vm10 = vcmask 261120  }
  0x1b   :  { %852 = vmatprep.mubr.msk.bf16.mxu0 %vm1025_vm0, %v1024_v0  ;;  %v486_v40 = vpack.c.bf16 %v485_v39, %v485_v39 }
  0x1d   :  { %214 = vrot.lane.b32.xlu0 %v118_v6, %s1028_s5  ;;  %v534_v48 = vsel %vm71_vm1, %v486_v40, 0 }
  0x8b   :  { %v121_v10 = vpop.permute.xlu0 %120 }
  0x8c   :  { %v126_v11 = vsel %vm71_vm1, %v121_v10, 0 }
  0x8d   :  { %851 = vmatpush3.bf16.msra.mxu0 %v126_v11 }
  0x8e   :  { %856 = vmatprep.subr.bf16.mxu0 %v1024_v0 }
  0x8f   :  { %v215_v14 = vpop.permute.xlu0 %214 }
  0x90   :  { %853 = vmatmul.mubr.msk.bf16.vlgmr.msra.gmra.mrb[4].mxu0 %vm67_vm3, %v1116_v12  ;;  %v220_v15 = vsel %vm71_vm1, %v215_v14, 0 }
  0x91   :  { %863 = vmatpush3.bf16.msra.mxu1 %v220_v15  ;;  %857 = vmatpush3.bf16.msra.mxu0 %v172_v13 }
  0x92   :  { %858 = vmatprep.mubr.msk.bf16.mxu0 %vm1025_vm0, %v1024_v0  ;;  %868 = vmatprep.subr.bf16.mxu0 %v1024_v0 }
  0x93   :  { %886 = vmatprep.subr.bf16.mxu1 %v1024_v0 }
  0x94   :  { %865 = vmatmul.mubr.msk.bf16.vlgmr.msra.gmra.mrb[0].mxu1 %vm67_vm3, %v1126_v16 }
  0x95   :  { %888 = vmatprep.mubr.msk.bf16.mxu1 %vm1025_vm0, %v1024_v0  ;;  %887 = vmatpush3.bf16.msra.mxu1 %v441_v43 }
  0x96   :  { %v1142_v30 = vpop.permute.xlu1 %265  ;;  %892 = vmatprep.subr.bf16.mxu1 %v1024_v0 }
  0x98   :  { %859 = vmatmul.mubr.msk.bf16.vlgmr.msra.gmra.mrb[8].mxu0 %vm67_vm3, %v42_v17 }
  0x99   :  { %870 = vmatprep.mubr.msk.bf16.mxu0 %vm1025_vm0, %v1024_v0 }
  0x9c   :  { %889 = vmatmul.mubr.msk.bf16.vlgmr.msra.gmra.mrb[4].mxu1 %vm67_vm3, %v1100_v7 }
  0x9d   :  { %894 = vmatprep.mubr.msk.bf16.mxu1 %vm1025_vm0, %v1024_v0 }
 0x163   :  { %v162_v18 = vpop.f32.mrb[4].mxu0 }
 0x164   :  { %v854_v19 = vpop.f32.mrb[5].mxu0 }
 0x165   :  { %v165_v20 = vpop.f32.mrb[6].mxu0 }
 0x166   :  { %v855_v21 = vpop.f32.mrb[7].mxu0 }
 0x167   :  { %v256_v22 = vpop.f32.mrb[0].mxu1  ;;  %v54_v21 = vld [vmem:[%s1228_s4] sm:$0xff]  ;;  %s1031_s4 = smov [#allocation6]  }
 0x168   :  { %v866_v23 = vpop.f32.mrb[1].mxu1 }
 0x169   :  { %v259_v24 = vpop.f32.mrb[2].mxu1 }
 0x16a   :  { %v867_v25 = vpop.f32.mrb[3].mxu1 }
 0x16b   :  { %v208_v26 = vpop.f32.mrb[8].mxu0 }
 0x16c   :  { %v209_v27 = vadd.f32 %v208_v26, %v162_v18  ;;  %v860_v28 = vpop.f32.mrb[9].mxu0 }
 0x16d   :  { %v211_v29 = vpop.f32.mrb[10].mxu0 }
 0x16e   :  { %v262_v31 = vadd.f32 %v256_v22, %v209_v27  ;;  %v861_v32 = vpop.f32.mrb[11].mxu0  ;;  %v55_v22 = vld [vmem:[%s1230_s6] sm:$0xff]  ;;  %s781_s6 = sshll.u32 %s1031_s4, 4  ;;  %s782_s6 = int_to_ptr.vmem [resolvable:$true] %s781_s6 }
 0x16f   :  { %s995_s9 = scalar_lea.vmem %s782_s6, 256  ;;  %p1000_p9 = scmp.lt.s32.totalorder %s782_s6, %s782_s6 }
 0x170   :  { %v268_v33 = vadd.f32 %v1142_v30, %v262_v31  ;;  %p996_p8 = scmp.ne.s32.totalorder %s782_s6, %s995_s9  ;;  %p1001_p10 = scmp.lt.s32.totalorder %s995_s9, %s995_s9 }
 0x172   :  { %vm269_vm6 = vcmp.gt.f32.partialorder %v268_v33, 0.0  ;;  %v270_v34 = vmul.f32 0.2, %v268_v33  ;;  %p1002_p11 = por %p1001_p10, %p1000_p9 }
 0x174   :  { %v271_v35 = vsel %vm269_vm6, %v268_v33, %v270_v34  ;;  %p1003_p12 = pnand %p1002_p11, %p996_p8 }
 0x175   :  { %v814_v36 = vpack.c.bf16 %v271_v35, %v271_v35 }
 0x177   :  { %276 = vrot.lane.b32.xlu1 %v814_v36, %s1023_s12 }
 0x17b   :  { %488 = vrot.lane.b32.xlu1 %v486_v40, %s1026_s20 }
 0x17f   :  { %576 = vrot.lane.b32.xlu1 %v486_v40, %s1028_s5 }
 0x1e9   :  { %v277_v41 = vpop.permute.xlu1 %276 }
 0x1ea   :  { %280 = vst.msk [vmem:[#allocation2] sm:$0xf] %vm279_vm8, %v277_v41 }
 0x1ed   :  { %v489_v44 = vpop.permute.xlu1 %488 }
 0x1ee   :  { %v491_v46 = vsel %vm71_vm1, %v489_v44, 0 }
 0x1ef   :  { %893 = vmatpush3.bf16.msra.mxu1 %v491_v46 }
 0x1f0   :  { %898 = vmatprep.subr.bf16.mxu1 %v1024_v0 }
 0x1f1   :  { %v281_v45 = vld [vmem:[#allocation2] sm:$0xf]  ;;  %v577_v56 = vpop.permute.xlu1 %576 }
 0x1f2   :  { %v800_v47 = vcombine.low %v281_v45, %v281_v45  ;;  %895 = vmatmul.mubr.msk.bf16.vlgmr.msra.gmra.mrb[8].mxu1 %vm67_vm3, %v1116_v12  ;;  %v337_v52 = vsel %vm71_vm1, %v281_v45, 0  ;;  %v579_v58 = vsel %vm71_vm1, %v577_v56, 0 }
 0x1f3   :  { %899 = vmatpush3.bf16.msra.mxu1 %v534_v48  ;;  %900 = vmatprep.mubr.msk.bf16.mxu1 %vm1025_vm0, %v1024_v0 }
 0x1f4   :  { %285 = vrot.lane.b32.xlu0 %v800_v47, %s1029_s0  ;;  %910 = vmatprep.subr.bf16.mxu1 %v1024_v0 }
 0x1f8   :  { %379 = vrot.lane.b32.xlu0 %v800_v47, %s1030_s27 }
 0x1fa   :  { %901 = vmatmul.mubr.msk.bf16.vlgmr.msra.gmra.mrb[12].mxu1 %vm67_vm3, %v42_v17 }
 0x1fb   :  { %912 = vmatprep.mubr.msk.bf16.mxu1 %vm1025_vm0, %v1024_v0 }
 0x266   :  { %v286_v49 = vpop.permute.xlu0 %285 }
 0x267   :  { %v291_v50 = vsel %vm71_vm1, %v286_v49, 0 }
 0x268   :  { %869 = vmatpush3.bf16.msra.mxu0 %v291_v50 }
 0x269   :  { %874 = vmatprep.subr.bf16.mxu0 %v1024_v0 }
 0x26a   :  { %v380_v53 = vpop.permute.xlu0 %379 }
 0x26b   :  { %871 = vmatmul.mubr.msk.bf16.vlgmr.msra.gmra.mrb[0].mxu0 %vm67_vm3, %v49_v51  ;;  %v385_v55 = vsel %vm71_vm1, %v380_v53, 0 }
 0x26c   :  { %875 = vmatpush3.bf16.msra.mxu0 %v337_v52  ;;  %876 = vmatprep.mubr.msk.bf16.mxu0 %vm1025_vm0, %v1024_v0 }
 0x26d   :  { %880 = vmatprep.subr.bf16.mxu0 %v1024_v0 }
 0x277   :  { %877 = vmatmul.mubr.msk.bf16.vlgmr.msra.gmra.mrb[0].mxu0 %vm67_vm3, %v47_v54 }
 0x278   :  { %881 = vmatpush3.bf16.msra.mxu0 %v385_v55  ;;  %882 = vmatprep.mubr.msk.bf16.mxu0 %vm1025_vm0, %v1024_v0 }
 0x279   :  { %904 = vmatprep.subr.bf16.mxu0 %v1024_v0 }
 0x283   :  { %883 = vmatmul.mubr.msk.bf16.vlgmr.msra.gmra.mrb[0].mxu0 %vm67_vm3, %v51_v57 }
 0x284   :  { %905 = vmatpush3.bf16.msra.mxu0 %v579_v58  ;;  %906 = vmatprep.mubr.msk.bf16.mxu0 %vm1025_vm0, %v1024_v0 }
 0x28b   :  { %907 = vmatmul.mubr.msk.bf16.vlgmr.msra.gmra.mrb[12].mxu0 %vm67_vm3, %v1126_v16 }
 0x2c5   :  { %v527_v59 = vpop.f32.mrb[8].mxu1 }
 0x2c6   :  { %v896_v60 = vpop.f32.mrb[9].mxu1 }
 0x2c7   :  { %v530_v61 = vpop.f32.mrb[10].mxu1 }
 0x2c8   :  { %v897_v62 = vpop.f32.mrb[11].mxu1 }
 0x2cd   :  { %v570_v63 = vpop.f32.mrb[12].mxu1 }
 0x2ce   :  { %v571_v1 = vadd.f32 %v570_v63, %v527_v59  ;;  %v902_v2 = vpop.f32.mrb[13].mxu1 }
 0x2cf   :  { %v573_v3 = vpop.f32.mrb[14].mxu1 }
 0x2d0   :  { %v903_v4 = vpop.f32.mrb[15].mxu1 }
 0x356   :  { %v421_v5 = vpop.f32.mrb[0].mxu0 }
 0x357   :  { %v884_v6 = vpop.f32.mrb[1].mxu0 }
 0x358   :  { %v424_v7 = vpop.f32.mrb[2].mxu0 }
 0x359   :  { %v885_v8 = vpop.f32.mrb[3].mxu0 }
 0x35e   :  { %v615_v9 = vpop.f32.mrb[12].mxu0 }
 0x35f   :  { %v621_v10 = vadd.f32 %v615_v9, %v571_v1  ;;  %v908_v11 = vpop.f32.mrb[13].mxu0 }
 0x360   :  { %v618_v12 = vpop.f32.mrb[14].mxu0 }
 0x361   :  { %v622_v13 = vadd.f32 %v621_v10, %v1142_v30  ;;  %v909_v14 = vpop.f32.mrb[15].mxu0 }
 0x363   :  { %vm623_vm9 = vcmp.gt.f32.partialorder %v622_v13, 0.0  ;;  %v624_v15 = vmul.f32 0.2, %v622_v13 }
 0x365   :  { %v625_v16 = vsel %vm623_vm9, %v622_v13, %v624_v15 }
 0x366   :  { %v815_v17 = vpack.c.bf16 %v625_v16, %v625_v16 }
 0x368   :  { %630 = vrot.lane.b32.xlu0 %v815_v17, %s1023_s12 }
 0x3da   :  { %v631_v18 = vpop.permute.xlu0 %630 }
 0x3db   :  { %633 = vst.msk [vmem:[#allocation2] sm:$0xf] %vm279_vm8, %v631_v18 }
 0x3e2   :  { %v634_v19 = vld [vmem:[#allocation2] sm:$0xf] }
 0x3e3   :  { %v810_v20 = vcombine.low %v634_v19, %v634_v19  ;;  %v684_v25 = vsel %vm71_vm1, %v634_v19, 0 }
 0x3e5   :  { %726 = vrot.lane.b32.xlu0 %v810_v20, %s1030_s27  ;;  %638 = vrot.lane.b32.xlu1 %v810_v20, %s1029_s0 }
 0x3e9   :  { %430 = vperm.xlu0 %970, %v54_v21   ;;  %64 = vperm.xlu1 %969, %v55_v22  }
 0x457   :  { %v639_v23 = vpop.permute.xlu1 %638  ;;  %v727_v26 = vpop.permute.xlu0 %726 }
 0x458   :  { %v641_v24 = vsel %vm71_vm1, %v639_v23, 0  ;;  %v729_v27 = vsel %vm71_vm1, %v727_v26, 0 }
 0x459   :  { %911 = vmatpush3.bf16.msra.mxu1 %v641_v24 }
 0x45a   :  { %916 = vmatprep.subr.bf16.mxu1 %v1024_v0 }
 0x45c   :  { %913 = vmatmul.mubr.msk.bf16.vlgmr.msra.gmra.mrb[4].mxu1 %vm67_vm3, %v49_v51 }
 0x45d   :  { %917 = vmatpush3.bf16.msra.mxu1 %v684_v25  ;;  %918 = vmatprep.mubr.msk.bf16.mxu1 %vm1025_vm0, %v1024_v0 }
 0x45e   :  { %922 = vmatprep.subr.bf16.mxu1 %v1024_v0 }
 0x468   :  { %v431_v28 = vpop.permute.xlu0 %430  ;;  %919 = vmatmul.mubr.msk.bf16.vlgmr.msra.gmra.mrb[4].mxu1 %vm67_vm3, %v47_v54  ;;  %v65_v29 = vpop.permute.xlu1 %64 }
 0x469   :  { %923 = vmatpush3.bf16.msra.mxu1 %v729_v27  ;;  %v928_v30 = vadd.f32 %v421_v5, %v65_v29  ;;  %v930_v31 = vadd.f32 %v431_v28, %v65_v29  ;;  %924 = vmatprep.mubr.msk.bf16.mxu1 %vm1025_vm0, %v1024_v0 }
 0x46b   :  { %v929_v32 = vadd.f32 %v928_v30, %v431_v28 }
 0x46d   :  { %436 = vst.msk [vmem:[#allocation6] sm:$0xff] %vm435_vm10, %v929_v32 }
 0x474   :  { %925 = vmatmul.mubr.msk.bf16.vlgmr.msra.gmra.mrb[4].mxu1 %vm67_vm3, %v51_v57 }
 0x547   :  { %v765_v33 = vpop.f32.mrb[4].mxu1 }
 0x548   :  { %v931_v34 = vadd.f32 %v930_v31, %v765_v33  ;;  %v926_v35 = vpop.f32.mrb[5].mxu1 }
 0x549   :  { %v768_v36 = vpop.f32.mrb[6].mxu1 }
 0x54a   :  { %775 = vst.msk [vmem:[#allocation6 + $0x8] sm:$0xff] %vm435_vm10, %v931_v34  ;;  %v927_v37 = vpop.f32.mrb[7].mxu1 }
 0x54b   :  { %1006 = shalt.err (!%p1003_p12)
}
 0x54c   :  { %s1007_s12 = scalar_lea.hbm %s1231_s7, 256 }
 0x54d   :  { %p1008_p13 = scmp.ne.s32.totalorder %s1231_s7, %s1007_s12  ;;  %p1011_p0 = scmp.lt.u32.totalorder %s1007_s12, %s1231_s7 }
 0x54f   :  { %p1013_p1 = pnand %p1011_p0, %p1008_p13 }
 0x551   :  { %1016 = shalt.err (!%p1013_p1)
}
 0x552   :  { %s1032_s3 = smov 128   ;;  %s1033_s17 = smov 8  }
 0x553   :  { %787 = dma.vmem_to_hbm [thread:$0]  %s782_s6, 256, %s1231_s7, [#allocation5], %s1032_s3, %s1032_s3, %s1033_s17  }
 0x554   :  { %1019 = dma.done.wait [#allocation5], 256  }
 0x555   :  { %1020 = vsyncadd [#allocation5], 4294967040 }
 0x556   :  { %791 = vsyncpa [#allocation4], 1 }
 0x557   :  { %792 = vsyncpa [#allocation5], 1 }

</bundles_post_ra>
